<compile_context>
chip_gen: v5e
topology: v5e:2x2
jax: 0.10.0
libtpu: 0.0.40
codegen_flags: <defaults>
</compile_context>

<pallas_src>
import functools
import math

import jax
import jax.numpy as jnp
from jax.experimental import pallas as pl
from jax.experimental.pallas import tpu as pltpu

# TODO(synk): only the default method='sobel' branch is implemented; the
# method='diff' branch of the PyTorch module is not covered by this kernel.

# Sobel kernels (same values the PyTorch module registers as buffers).
_SOBEL_X = ((-1.0, 0.0, 1.0), (-2.0, 0.0, 2.0), (-1.0, 0.0, 1.0))
_SOBEL_Y = ((-1.0, -2.0, -1.0), (0.0, 0.0, 0.0), (1.0, 2.0, 1.0))


def _sobel_grad_sq(d, row_in_plane, H, W):
    """(Sobel_x * d)^2 + (Sobel_y * d)^2 with zero padding at image borders.

    d            : (R, W) f32, R = planes_per_block * H (planes stacked on rows)
    row_in_plane : (R, W) i32, row index of each element inside its image plane
    """
    R = d.shape[0]
    lane = jax.lax.broadcasted_iota(jnp.int32, (R, W), 1)

    # Masks computed once and reused (compares are VPU work; keep them minimal).
    has_left = lane >= 1
    has_right = lane < W - 1
    has_up = row_in_plane >= 1
    has_down = row_in_plane < H - 1

    # Horizontal neighbours (lane rolls) with zero fill at x = 0 / x = W-1.
    d_xp = jnp.where(has_right, pltpu.roll(d, (W - 1) % W, axis=1), 0.0)  # d[., x+1]
    d_xm = jnp.where(has_left, pltpu.roll(d, 1 % W, axis=1), 0.0)         # d[., x-1]

    hx = d_xp - d_xm                  # horizontal [-1, 0, 1]
    hy = (d_xm + d_xp) + 2.0 * d      # horizontal [ 1, 2, 1]

    # Vertical neighbours (sublane rolls) with zero fill at per-plane borders.
    hx_up = jnp.where(has_up, pltpu.roll(hx, 1 % R, axis=0), 0.0)         # hx[y-1]
    hx_dn = jnp.where(has_down, pltpu.roll(hx, (R - 1) % R, axis=0), 0.0)  # hx[y+1]
    hy_up = jnp.where(has_up, pltpu.roll(hy, 1 % R, axis=0), 0.0)
    hy_dn = jnp.where(has_down, pltpu.roll(hy, (R - 1) % R, axis=0), 0.0)

    gx = (hx_up + hx_dn) + 2.0 * hx   # vertical [ 1, 2, 1]  -> Sobel X
    gy = hy_dn - hy_up                # vertical [-1, 0, 1]  -> Sobel Y
    return gx * gx + gy * gy


def _grad_loss_kernel_unweighted(p_ref, t_ref, sum_ref, *, H, W, n_valid_rows):
    R = p_ref.shape[0]
    d = p_ref[...].astype(jnp.float32) - t_ref[...].astype(jnp.float32)

    rows = jax.lax.broadcasted_iota(jnp.int32, (R, W), 0)
    row_in_plane = rows if R == H else rows % H
    gl = _sobel_grad_sq(d, row_in_plane, H, W)

    if n_valid_rows is None:               # block count divides plane count
        s = jnp.sum(gl)
    else:                                   # mask the ragged last block
        g = pl.program_id(0)
        valid = (g * R + rows) < n_valid_rows
        s = jnp.sum(jnp.where(valid, gl, 0.0))

    sum_ref[...] = jnp.full(sum_ref.shape, s, dtype=sum_ref.dtype)


def _grad_loss_kernel_weighted(p_ref, t_ref, w_ref, sum_ref, wsum_ref, cnt_ref,
                               *, H, W, n_valid_rows):
    R = p_ref.shape[0]
    d = p_ref[...].astype(jnp.float32) - t_ref[...].astype(jnp.float32)

    rows = jax.lax.broadcasted_iota(jnp.int32, (R, W), 0)
    row_in_plane = rows if R == H else rows % H
    gl = _sobel_grad_sq(d, row_in_plane, H, W)

    w = w_ref[...].astype(jnp.float32)
    w_pos = w > 0.0

    if n_valid_rows is None:
        s = jnp.sum(gl)                                   # unweighted fallback sum
        ws = jnp.sum(jnp.where(w_pos, gl * w, 0.0))       # weighted sum over valid
        c = jnp.sum(jnp.where(w_pos, 1.0, 0.0))           # valid count (exact, <2^24)
    else:
        g = pl.program_id(0)
        valid_rows = (g * R + rows) < n_valid_rows
        valid_w = jnp.logical_and(valid_rows, w_pos)
        s = jnp.sum(jnp.where(valid_rows, gl, 0.0))
        ws = jnp.sum(jnp.where(valid_w, gl * w, 0.0))
        c = jnp.sum(jnp.where(valid_w, 1.0, 0.0))

    sum_ref[...] = jnp.full(sum_ref.shape, s, dtype=sum_ref.dtype)
    wsum_ref[...] = jnp.full(wsum_ref.shape, ws, dtype=wsum_ref.dtype)
    cnt_ref[...] = jnp.full(cnt_ref.shape, c.astype(jnp.int32), dtype=cnt_ref.dtype)


def _planes_per_block(n_planes, H, W, target_bytes):
    """Planes per block: as large as the byte target allows, (nb*H) % 8 == 0
    unless nb == n_planes, and preferring a divisor of n_planes (no ragged
    last block -> no per-element validity masking in the kernel)."""
    plane_bytes = H * W * 4
    nb_max = max(1, target_bytes // plane_bytes)
    if nb_max >= n_planes:
        return n_planes

    unit = 8 // math.gcd(H, 8)                      # keeps (nb * H) % 8 == 0
    nb_aligned = max(unit, (nb_max // unit) * unit)
    if nb_aligned >= n_planes:
        return n_planes

    # Prefer an exact divisor of n_planes if it costs < 25% of the block size.
    for nb in range(nb_aligned, 0, -1):
        if nb % unit == 0 and n_planes % nb == 0:
            if 4 * nb >= 3 * nb_aligned:
                return nb
            break
    return nb_aligned


def gradient_loss_sobel(pred, target, tid_weights=None, *,
                        block_target_bytes=2 * 1024 * 1024):
    """Pallas implementation of GradientLoss(method='sobel').forward."""
    B, C, H, W = pred.shape
    assert C == 1, "Sobel path of GradientLoss needs C == 1 (conv weight is (1,1,3,3))"
    N = B * C
    n_rows = N * H

    # Free reshape (contiguous): planes stacked along the sublane axis.
    p = pred.reshape(n_rows, W)
    t = target.reshape(n_rows, W)

    nb = _planes_per_block(N, H, W, block_target_bytes)
    R = nb * H
    G = pl.cdiv(N, nb)
    ragged = (N % nb) != 0
    n_valid_rows = n_rows if ragged else None

    in_spec = pl.BlockSpec((R, W), lambda g: (g, 0))
    out_spec = pl.BlockSpec((1, 8, 128), lambda g: (g, 0, 0))
    part_f32 = jax.ShapeDtypeStruct((G, 8, 128), jnp.float32)
    part_i32 = jax.ShapeDtypeStruct((G, 8, 128), jnp.int32)

    cparams = pltpu.CompilerParams(
        dimension_semantics=("parallel",),
        vmem_limit_bytes=32 * 1024 * 1024,
    )

    total_elems = jnp.float32(N * H * W)

    if tid_weights is None:
        kernel = functools.partial(
            _grad_loss_kernel_unweighted, H=H, W=W, n_valid_rows=n_valid_rows)
        parts = pl.pallas_call(
            kernel,
            out_shape=part_f32,
            grid_spec=pltpu.PrefetchScalarGridSpec(
                num_scalar_prefetch=0,
                grid=(G,),
                in_specs=[in_spec, in_spec],
                out_specs=out_spec),
            compiler_params=cparams,
        )(p, t)
        return parts[:, 0, 0].sum() / total_elems          # grad_loss.mean()

    w = tid_weights.reshape(n_rows, W)
    kernel = functools.partial(
        _grad_loss_kernel_weighted, H=H, W=W, n_valid_rows=n_valid_rows)
    s_p, ws_p, c_p = pl.pallas_call(
        kernel,
        out_shape=(part_f32, part_f32, part_i32),
        grid_spec=pltpu.PrefetchScalarGridSpec(
            num_scalar_prefetch=0,
            grid=(G,),
            in_specs=[in_spec, in_spec, in_spec],
            out_specs=[out_spec, out_spec, out_spec]),
        compiler_params=cparams,
    )(p, t, w)

    mean_loss = s_p[:, 0, 0].sum() / total_elems
    wsum = ws_p[:, 0, 0].sum()
    cnt = c_p[:, 0, 0].sum()
    # weighted_grad_loss[valid_mask].mean() if valid_mask.sum() > 0 else grad_loss.mean()
    return jnp.where(cnt > 0, wsum / jnp.maximum(cnt.astype(jnp.float32), 1.0), mean_loss)


def _reference_jax(pred, target, tid_weights=None):
    """Pure-JAX reference mirroring the PyTorch semantics (for sanity check)."""
    sx = jnp.array(_SOBEL_X, jnp.float32)
    sy = jnp.array(_SOBEL_Y, jnp.float32)
    x = pred.astype(jnp.float32)
    y = target.astype(jnp.float32)

    def conv(img, k):
        k4 = k.reshape(1, 1, 3, 3)
        return jax.lax.conv_general_dilated(
            img, k4, window_strides=(1, 1), padding=((1, 1), (1, 1)),
            dimension_numbers=("NCHW", "OIHW", "NCHW"))

    gl = (conv(x, sx) - conv(y, sx)) ** 2 + (conv(x, sy) - conv(y, sy)) ** 2
    if tid_weights is None:
        return gl.mean()
    w = tid_weights.astype(jnp.float32)
    valid = w > 0
    cnt = valid.sum()
    return jnp.where(cnt > 0,
                     jnp.where(valid, gl * w, 0.0).sum() / jnp.maximum(cnt, 1),
                     gl.mean())


if __name__ == "__main__":
    key = jax.random.PRNGKey(0)
    k1, k2, k3 = jax.random.split(key, 3)
    B, C, H, W = 2, 1, 16, 16   # Sobel path requires C == 1
    pred = jax.random.normal(k1, (B, C, H, W), jnp.float32)
    target = jax.random.normal(k2, (B, C, H, W), jnp.float32)
    tid_w = jax.random.uniform(k3, (B, C, H, W), jnp.float32) - 0.3   # some <= 0

    # tid_weights = None path (single block, no ragged masking)
    out = jax.block_until_ready(gradient_loss_sobel(pred, target))
    ref = _reference_jax(pred, target)
    assert jnp.allclose(out, ref, rtol=1e-4, atol=1e-5), (out, ref)

    # tid_weights path
    out_w = jax.block_until_ready(gradient_loss_sobel(pred, target, tid_w))
    ref_w = _reference_jax(pred, target, tid_w)
    assert jnp.allclose(out_w, ref_w, rtol=1e-4, atol=1e-5), (out_w, ref_w)

    # Multi-block grid with a ragged last block (N=3 planes, 2 planes per block).
    k4, k5, k6 = jax.random.split(k3, 3)
    pred2 = jax.random.normal(k4, (3, 1, H, W), jnp.float32)
    target2 = jax.random.normal(k5, (3, 1, H, W), jnp.float32)
    tid_w2 = jax.random.uniform(k6, (3, 1, H, W), jnp.float32) - 0.3
    small_blk = 2 * H * W * 4

    out2u = jax.block_until_ready(
        gradient_loss_sobel(pred2, target2, block_target_bytes=small_blk))
    ref2u = _reference_jax(pred2, target2)
    assert jnp.allclose(out2u, ref2u, rtol=1e-4, atol=1e-5), (out2u, ref2u)

    out2 = jax.block_until_ready(
        gradient_loss_sobel(pred2, target2, tid_w2, block_target_bytes=small_blk))
    ref2 = _reference_jax(pred2, target2, tid_w2)
    assert jnp.allclose(out2, ref2, rtol=1e-4, atol=1e-5), (out2, ref2)

    print("KERNEL_OK")
</pallas_src>

<mosaic_0001>
module attributes {stable_mosaic.version = 11 : i64} {
  func.func @_grad_loss_kernel_unweighted(%arg0: i32, %arg1: memref<32x16xf32, #tpu.memory_space<vmem>>, %arg2: memref<32x16xf32, #tpu.memory_space<vmem>>, %arg3: memref<1x8x128xf32, #tpu.memory_space<vmem>>) attributes {dimension_semantics = [#tpu.dimension_semantics<parallel>], iteration_bounds = array<i64: 1>, scalar_prefetch = 0 : i64, scratch_operands = 0 : i64, tpu.core_type = #tpu.core_type<tc>, window_params = [{transform_indices = @transform_0, window_bounds = array<i64: 32, 16>}, {transform_indices = @transform_1, window_bounds = array<i64: 32, 16>}, {transform_indices = @transform_2, window_bounds = array<i64: 1, 8, 128>}]} {
    %c0 = arith.constant 0 : index
    %c0_0 = arith.constant 0 : index
    %0 = vector.load %arg1[%c0, %c0_0] : memref<32x16xf32, #tpu.memory_space<vmem>>, vector<32x16xf32>
    %c0_1 = arith.constant 0 : index
    %c0_2 = arith.constant 0 : index
    %1 = vector.load %arg2[%c0_1, %c0_2] : memref<32x16xf32, #tpu.memory_space<vmem>>, vector<32x16xf32>
    %2 = arith.subf %0, %1 : vector<32x16xf32>
    %3 = tpu.iota {dimensions = array<i32: 0>} : vector<32x16xi32>
    %c16_i32 = arith.constant 16 : i32
    %c0_i32 = arith.constant 0 : i32
    %4 = arith.cmpi eq, %c16_i32, %c0_i32 : i32
    %c1_i32 = arith.constant 1 : i32
    %5 = arith.select %4, %c1_i32, %c16_i32 : i32
    %6 = vector.broadcast %5 : i32 to vector<32x16xi32>
    %7 = arith.remsi %3, %6 : vector<32x16xi32>
    %c0_i32_3 = arith.constant 0 : i32
    %8 = vector.broadcast %c0_i32_3 : i32 to vector<32x16xi32>
    %9 = arith.cmpi ne, %7, %8 : vector<32x16xi32>
    %c0_i32_4 = arith.constant 0 : i32
    %10 = vector.broadcast %c0_i32_4 : i32 to vector<32x16xi32>
    %11 = arith.cmpi slt, %7, %10 : vector<32x16xi32>
    %c0_i32_5 = arith.constant 0 : i32
    %12 = arith.cmpi slt, %5, %c0_i32_5 : i32
    %13 = vector.broadcast %12 : i1 to vector<32x16xi1>
    %14 = vector.broadcast %13 : vector<32x16xi1> to vector<32x16xi1>
    %15 = arith.xori %11, %14 : vector<32x16xi1>
    %16 = arith.andi %15, %9 : vector<32x16xi1>
    %17 = vector.broadcast %5 : i32 to vector<32x16xi32>
    %18 = arith.addi %7, %17 : vector<32x16xi32>
    %19 = arith.select %16, %18, %7 : vector<32x16xi1>, vector<32x16xi32>
    %20 = tpu.iota {dimensions = array<i32: 1>} : vector<32x16xi32>
    %c1_i32_6 = arith.constant 1 : i32
    %21 = vector.broadcast %c1_i32_6 : i32 to vector<32x16xi32>
    %22 = arith.cmpi sge, %20, %21 : vector<32x16xi32>
    %c15_i32 = arith.constant 15 : i32
    %23 = vector.broadcast %c15_i32 : i32 to vector<32x16xi32>
    %24 = arith.cmpi slt, %20, %23 : vector<32x16xi32>
    %c1_i32_7 = arith.constant 1 : i32
    %25 = vector.broadcast %c1_i32_7 : i32 to vector<32x16xi32>
    %26 = arith.cmpi sge, %19, %25 : vector<32x16xi32>
    %c15_i32_8 = arith.constant 15 : i32
    %27 = vector.broadcast %c15_i32_8 : i32 to vector<32x16xi32>
    %28 = arith.cmpi slt, %19, %27 : vector<32x16xi32>
    %c15_i32_9 = arith.constant 15 : i32
    %29 = tpu.dynamic_rotate %2 by %c15_i32_9 dim 1 : vector<32x16xf32>, i32 -> vector<32x16xf32>
    %cst = arith.constant 0.000000e+00 : f32
    %30 = vector.broadcast %cst : f32 to vector<32x16xf32>
    %31 = arith.select %24, %29, %30 : vector<32x16xi1>, vector<32x16xf32>
    %c1_i32_10 = arith.constant 1 : i32
    %32 = tpu.dynamic_rotate %2 by %c1_i32_10 dim 1 : vector<32x16xf32>, i32 -> vector<32x16xf32>
    %cst_11 = arith.constant 0.000000e+00 : f32
    %33 = vector.broadcast %cst_11 : f32 to vector<32x16xf32>
    %34 = arith.select %22, %32, %33 : vector<32x16xi1>, vector<32x16xf32>
    %35 = arith.subf %31, %34 : vector<32x16xf32>
    %36 = arith.addf %34, %31 : vector<32x16xf32>
    %cst_12 = arith.constant 2.000000e+00 : f32
    %37 = vector.broadcast %cst_12 : f32 to vector<32x16xf32>
    %38 = arith.mulf %37, %2 : vector<32x16xf32>
    %39 = arith.addf %36, %38 : vector<32x16xf32>
    %c1_i32_13 = arith.constant 1 : i32
    %40 = tpu.dynamic_rotate %35 by %c1_i32_13 dim 0 : vector<32x16xf32>, i32 -> vector<32x16xf32>
    %cst_14 = arith.constant 0.000000e+00 : f32
    %41 = vector.broadcast %cst_14 : f32 to vector<32x16xf32>
    %42 = arith.select %26, %40, %41 : vector<32x16xi1>, vector<32x16xf32>
    %c31_i32 = arith.constant 31 : i32
    %43 = tpu.dynamic_rotate %35 by %c31_i32 dim 0 : vector<32x16xf32>, i32 -> vector<32x16xf32>
    %cst_15 = arith.constant 0.000000e+00 : f32
    %44 = vector.broadcast %cst_15 : f32 to vector<32x16xf32>
    %45 = arith.select %28, %43, %44 : vector<32x16xi1>, vector<32x16xf32>
    %c1_i32_16 = arith.constant 1 : i32
    %46 = tpu.dynamic_rotate %39 by %c1_i32_16 dim 0 : vector<32x16xf32>, i32 -> vector<32x16xf32>
    %cst_17 = arith.constant 0.000000e+00 : f32
    %47 = vector.broadcast %cst_17 : f32 to vector<32x16xf32>
    %48 = arith.select %26, %46, %47 : vector<32x16xi1>, vector<32x16xf32>
    %c31_i32_18 = arith.constant 31 : i32
    %49 = tpu.dynamic_rotate %39 by %c31_i32_18 dim 0 : vector<32x16xf32>, i32 -> vector<32x16xf32>
    %cst_19 = arith.constant 0.000000e+00 : f32
    %50 = vector.broadcast %cst_19 : f32 to vector<32x16xf32>
    %51 = arith.select %28, %49, %50 : vector<32x16xi1>, vector<32x16xf32>
    %52 = arith.addf %42, %45 : vector<32x16xf32>
    %cst_20 = arith.constant 2.000000e+00 : f32
    %53 = vector.broadcast %cst_20 : f32 to vector<32x16xf32>
    %54 = arith.mulf %53, %35 : vector<32x16xf32>
    %55 = arith.addf %52, %54 : vector<32x16xf32>
    %56 = arith.subf %51, %48 : vector<32x16xf32>
    %57 = arith.mulf %55, %55 : vector<32x16xf32>
    %58 = arith.mulf %56, %56 : vector<32x16xf32>
    %59 = arith.addf %57, %58 : vector<32x16xf32>
    %60 = vector.shape_cast %59 : vector<32x16xf32> to vector<1x32x16xf32>
    %cst_21 = arith.constant dense<0.000000e+00> : vector<1xf32>
    %61 = vector.multi_reduction <add>, %60, %cst_21 [1, 2] : vector<1x32x16xf32> to vector<1xf32>
    %62 = vector.shape_cast %61 : vector<1xf32> to vector<1x1x1xf32>
    %63 = vector.extract %62[0, 0, 0] : f32 from vector<1x1x1xf32>
    %64 = vector.broadcast %63 : f32 to vector<1x8x128xf32>
    %c0_22 = arith.constant 0 : index
    %c0_23 = arith.constant 0 : index
    %c0_24 = arith.constant 0 : index
    %65 = vector.load %arg3[%c0_22, %c0_23, %c0_24] : memref<1x8x128xf32, #tpu.memory_space<vmem>>, vector<1x8x128xf32>
    tpu.vector_store %arg3[%c0_22, %c0_23, %c0_24], %64 {strides = array<i32>} : memref<1x8x128xf32, #tpu.memory_space<vmem>>, vector<1x8x128xf32>,
    return
  }
  func.func @transform_0(%arg0: i32) -> (i32, i32) {
    %c0_i32 = arith.constant 0 : i32
    %c0_i32_0 = arith.constant 0 : i32
    return %arg0, %c0_i32 : i32, i32
  }
  func.func @transform_1(%arg0: i32) -> (i32, i32) {
    %c0_i32 = arith.constant 0 : i32
    %c0_i32_0 = arith.constant 0 : i32
    return %arg0, %c0_i32 : i32, i32
  }
  func.func @transform_2(%arg0: i32) -> (i32, i32, i32) {
    %c0_i32 = arith.constant 0 : i32
    %c0_i32_0 = arith.constant 0 : i32
    %c0_i32_1 = arith.constant 0 : i32
    return %arg0, %c0_i32, %c0_i32_0 : i32, i32, i32
  }
}

</mosaic_0001>

<bundles_post_ra>
// kernel: tpu_custom_call.1
= control target key start
LH: loop header
LB: loop body
LE: loop exit
PB: predicated region body
PF: predicated region fallthrough
CT: control target
= control target key end

     0   :  { %s466_s0 = inlined_call_operand.vmem [shape: f32[32,16], index: 0, kind: input, shape index: {}]   ;;  %s467_s1 = inlined_call_operand.vmem [shape: f32[32,16], index: 1, kind: input, shape index: {}]   ;;  %s468_s2 = inlined_call_operand.hbm [shape: f32[1,8,128], index: 2, kind: output, shape index: {}]  }
   0x1   :  { %v14_v0 = vld [vmem:[%s466_s0 + $0x10] sm:$0xff]  ;;  %v12_v2 = vld [vmem:[%s466_s0] sm:$0xff] }
   0x2   :  { %v18_v1 = vld [vmem:[%s467_s1 + $0x10] sm:$0xff]  ;;  %v16_v4 = vld [vmem:[%s467_s1] sm:$0xff] }
   0x3   :  { %v339_v3 = vsub.f32 %v14_v0, %v18_v1  ;;  %v20_v5 = vsub.f32 %v12_v2, %v16_v4 }
   0x4   :  { %7 = vsyncpa [#allocation3], 0  ;;  %s311_s17 = smov 16   ;;  %v15_v6 = vld [vmem:[%s466_s0 + $0x18] sm:$0xff]  ;;  %v13_v8 = vld [vmem:[%s466_s0 + $0x8] sm:$0xff]  ;;  %vm89_vm0 = vcmask 1047680   ;;  %v24_v30 = vlaneseq }
   0x5   :  { %96 = vrot.lane.b32.xlu1 %v339_v3, %s311_s17  ;;  %90 = vrot.lane.b32.xlu0 %v20_v5, %s311_s17  ;;  %v19_v7 = vld [vmem:[%s467_s1 + $0x18] sm:$0xff]  ;;  %v17_v9 = vld [vmem:[%s467_s1 + $0x8] sm:$0xff]  ;;  %s312_s0 = smov 127   ;;  %s313_s1 = smov 113   ;;  %v158_v40 = vmul.f32 2.0, %v20_v5  ;;  %v160_v47 = vmul.f32 2.0, %v339_v3 }
   0x6   :  { %v357_v10 = vsub.f32 %v15_v6, %v19_v7  ;;  %v21_v11 = vsub.f32 %v13_v8, %v17_v9  ;;  %v78_v32 = vand.u32 127, %v24_v30  ;;  %v372_v33 = vshrl.u32 %v24_v30, 7  ;;  %s314_s26 = smov [#allocation2]   ;;  %s270_s30 = sshll.u32 %s468_s2, 4  ;;  %s271_s30 = int_to_ptr.hbm [resolvable:$true] %s270_s30 }
   0x7   :  { %vm244_vm9 = vcmask 130048   ;;  %s268_s27 = sshll.u32 %s314_s26, 4  ;;  %s269_s27 = int_to_ptr.vmem [resolvable:$true] %s268_s27 }
   0x8   :  { %vm79_vm1 = vcmp.ge.s32.totalorder %v78_v32, 1  ;;  %vm80_vm2 = vcmp.lt.s32.totalorder %v78_v32, 15  ;;  %v26_v36 = vadd.s32 8, %v372_v33  ;;  %v27_v43 = vadd.s32 16, %v372_v33 }
   0x9   :  { %v28_v44 = vadd.s32 24, %v372_v33  ;;  %v33_v49 = vand.u32 15, %v372_v33  ;;  %v159_v53 = vmul.f32 2.0, %v21_v11  ;;  %vm170_vm4 = vcmp.lt.s32.totalorder %v372_v33, 1 }
   0xa   :  { %v40_v46 = vand.u32 15, %v26_v36  ;;  %v47_v54 = vand.u32 15, %v27_v43  ;;  %vm183_vm5 = vcmp.lt.s32.totalorder %v372_v33, 7  ;;  %v161_v57 = vmul.f32 2.0, %v357_v10 }
   0xb   :  { %v54_v55 = vand.u32 15, %v28_v44  ;;  %vm396_vm6 = vcmp.ge.s32.totalorder %v33_v49, 1 }
   0xc   :  { %vm387_vm3 = vcmp.lt.s32.totalorder %v40_v46, 15  ;;  %vm405_vm7 = vcmp.ge.s32.totalorder %v47_v54, 1 }
   0xd   :  { %99 = vrot.lane.b32.xlu1 %v357_v10, %s311_s17  ;;  %93 = vrot.lane.b32.xlu0 %v21_v11, %s311_s17  ;;  %vm409_vm8 = vcmp.lt.s32.totalorder %v54_v55, 15 }
  0x77   :  { %v97_v12 = vpop.permute.xlu1 %96  ;;  %v91_v13 = vpop.permute.xlu0 %90 }
  0x78   :  { %v98_v14 = vsel %vm89_vm0, %v97_v12, %v339_v3  ;;  %v92_v15 = vsel %vm89_vm0, %v91_v13, %v20_v5 }
  0x79   :  { %106 = vrot.lane.b32.xlu0 %v98_v14, %s311_s17  ;;  %102 = vrot.lane.b32.xlu2 %v92_v15, %s311_s17 }
  0x7f   :  { %v100_v16 = vpop.permute.xlu1 %99  ;;  %v94_v17 = vpop.permute.xlu0 %93 }
  0x80   :  { %v101_v18 = vsel %vm89_vm0, %v100_v16, %v357_v10  ;;  %v95_v19 = vsel %vm89_vm0, %v94_v17, %v21_v11 }
  0x81   :  { %108 = vrot.lane.b32.xlu1 %v101_v18, %s311_s17  ;;  %104 = vrot.lane.b32.xlu2 %v95_v19, %s311_s17 }
  0xd3   :  { %v103_v20 = vpop.permute.xlu2 %102 }
  0xd4   :  { %v110_v21 = vsel %vm89_vm0, %v103_v20, %v20_v5 }
  0xd5   :  { %118 = vrot.lane.b32.xlu2 %v110_v21, %s312_s0 }
  0xdb   :  { %v105_v22 = vpop.permute.xlu2 %104 }
  0xdc   :  { %v111_v23 = vsel %vm89_vm0, %v105_v22, %v21_v11 }
  0xdd   :  { %120 = vrot.lane.b32.xlu0 %v111_v23, %s312_s0 }
  0xe5   :  { %134 = vrot.lane.b32.xlu0 %v110_v21, %s313_s1 }
  0xeb   :  { %v107_v24 = vpop.permute.xlu0 %106 }
  0xec   :  { %v112_v25 = vsel %vm89_vm0, %v107_v24, %v339_v3 }
  0xed   :  { %122 = vrot.lane.b32.xlu1 %v112_v25, %s312_s0 }
  0xf3   :  { %v109_v26 = vpop.permute.xlu1 %108 }
  0xf4   :  { %v113_v27 = vsel %vm89_vm0, %v109_v26, %v357_v10 }
  0xf5   :  { %124 = vrot.lane.b32.xlu2 %v113_v27, %s312_s0  ;;  %140 = vrot.lane.b32.xlu0 %v113_v27, %s313_s1 }
  0xf6   :  { %136 = vrot.lane.b32.xlu1 %v111_v23, %s313_s1 }
  0xfd   :  { %138 = vrot.lane.b32.xlu2 %v112_v25, %s313_s1 }
 0x12f   :  { %v119_v28 = vpop.permute.xlu2 %118 }
 0x130   :  { %v130_v37 = vsel %vm80_vm2, %v119_v28, 0.0 }
 0x14f   :  { %v121_v29 = vpop.permute.xlu0 %120  ;;  %v125_v31 = vpop.permute.xlu2 %124 }
 0x150   :  { %v133_v58 = vsel %vm80_vm2, %v125_v31, 0.0  ;;  %v131_v59 = vsel %vm80_vm2, %v121_v29, 0.0 }
 0x157   :  { %v135_v34 = vpop.permute.xlu0 %134  ;;  %v139_v38 = vpop.permute.xlu2 %138 }
 0x158   :  { %v146_v35 = vsel %vm79_vm1, %v135_v34, 0.0  ;;  %v148_v45 = vsel %vm79_vm1, %v139_v38, 0.0 }
 0x159   :  { %v154_v39 = vadd.f32 %v146_v35, %v130_v37  ;;  %v150_v50 = vsub.f32 %v130_v37, %v146_v35 }
 0x15b   :  { %v383_v51 = vadd.f32 %v158_v40, %v154_v39  ;;  %v166_v62 = vrot.slane %v150_v50, 7  ;;  %v179_v63 = vrot.slane %v150_v50, 1  ;;  %v220_v1 = vmul.f32 2.0, %v150_v50 }
 0x15d   :  { %v192_v0 = vrot.slane %v383_v51, 7  ;;  %v204_v3 = vrot.slane %v383_v51, 1 }
 0x15f   :  { %v123_v41 = vpop.permute.xlu1 %122 }
 0x160   :  { %v132_v42 = vsel %vm80_vm2, %v123_v41, 0.0 }
 0x161   :  { %v156_v48 = vadd.f32 %v148_v45, %v132_v42  ;;  %v385_v52 = vsub.f32 %v132_v42, %v148_v45 }
 0x163   :  { %v164_v60 = vadd.f32 %v160_v47, %v156_v48  ;;  %v168_v4 = vrot.slane %v385_v52, 7  ;;  %v181_v5 = vrot.slane %v385_v52, 1  ;;  %v222_v10 = vmul.f32 2.0, %v385_v52 }
 0x165   :  { %v194_v14 = vrot.slane %v164_v60, 7  ;;  %v206_v15 = vrot.slane %v164_v60, 1 }
 0x167   :  { %v141_v2 = vpop.permute.xlu0 %140 }
 0x168   :  { %v137_v6 = vpop.permute.xlu1 %136  ;;  %v149_v7 = vsel %vm79_vm1, %v141_v2, 0.0 }
 0x169   :  { %v147_v11 = vsel %vm79_vm1, %v137_v6, 0.0  ;;  %v153_v12 = vsub.f32 %v133_v58, %v149_v7  ;;  %v157_v13 = vadd.f32 %v149_v7, %v133_v58 }
 0x16a   :  { %v151_v16 = vsub.f32 %v131_v59, %v147_v11  ;;  %v155_v17 = vadd.f32 %v147_v11, %v131_v59 }
 0x16b   :  { %v165_v18 = vadd.f32 %v161_v57, %v157_v13  ;;  %v169_v19 = vrot.slane %v153_v12, 7  ;;  %v182_v20 = vrot.slane %v153_v12, 1  ;;  %v223_v21 = vmul.f32 2.0, %v153_v12 }
 0x16c   :  { %v163_v22 = vadd.f32 %v159_v53, %v155_v17  ;;  %v167_v23 = vrot.slane %v151_v16, 7  ;;  %v180_v24 = vrot.slane %v151_v16, 1  ;;  %v221_v25 = vmul.f32 2.0, %v151_v16 }
 0x16d   :  { %v174_v26 = vsel %vm170_vm4, %v169_v19, %v166_v62  ;;  %v184_v27 = vsel %vm183_vm5, %v181_v5, %v182_v20  ;;  %v187_v28 = vsel %vm183_vm5, %v182_v20, %v179_v63  ;;  %v195_v29 = vrot.slane %v165_v18, 7 }
 0x16e   :  { %v172_v30 = vsel %vm170_vm4, %v167_v23, %v168_v4  ;;  %v173_v31 = vsel %vm170_vm4, %v166_v62, %v167_v23  ;;  %v185_v32 = vsel %vm183_vm5, %v180_v24, %v181_v5  ;;  %v186_v34 = vsel %vm183_vm5, %v179_v63, %v180_v24 }
 0x16f   :  { %v189_v35 = vsel %vm387_vm3, %v185_v32, 0.0  ;;  %v193_v36 = vrot.slane %v163_v22, 7  ;;  %v205_v37 = vrot.slane %v163_v22, 1  ;;  %v175_v38 = vsel %vm396_vm6, %v174_v26, 0.0 }
 0x170   :  { %v217_v39 = vadd.f32 %v189_v35, %v173_v31  ;;  %v199_v40 = vsel %vm170_vm4, %v195_v29, %v192_v0  ;;  %v207_v41 = vrot.slane %v165_v18, 1  ;;  %v216_v42 = vadd.f32 %v186_v34, %v175_v38 }
 0x171   :  { %v197_v43 = vsel %vm170_vm4, %v193_v36, %v194_v14  ;;  %v198_v44 = vsel %vm170_vm4, %v192_v0, %v193_v36  ;;  %v209_v45 = vsel %vm183_vm5, %v205_v37, %v206_v15  ;;  %v210_v46 = vsel %vm183_vm5, %v204_v3, %v205_v37 }
 0x172   :  { %v213_v47 = vsel %vm387_vm3, %v209_v45, 0.0  ;;  %v225_v48 = vadd.f32 %v221_v25, %v217_v39  ;;  %v200_v49 = vsel %vm396_vm6, %v199_v40, 0.0  ;;  %v171_v50 = vsel %vm170_vm4, %v168_v4, %v169_v19 }
 0x173   :  { %v177_v51 = vsel %vm405_vm7, %v172_v30, 0.0  ;;  %v191_v52 = vsel %vm409_vm8, %v187_v28, 0.0  ;;  %v196_v53 = vsel %vm170_vm4, %v194_v14, %v195_v29  ;;  %v202_v54 = vsel %vm405_vm7, %v197_v43, 0.0 }
 0x174   :  { %v233_v55 = vmul.f32 %v225_v48, %v225_v48  ;;  %v208_v56 = vsel %vm183_vm5, %v206_v15, %v207_v41  ;;  %v211_v57 = vsel %vm183_vm5, %v207_v41, %v204_v3  ;;  %v218_v58 = vadd.f32 %v184_v27, %v177_v51 }
 0x175   :  { %v215_v59 = vsel %vm409_vm8, %v211_v57, 0.0  ;;  %v219_v60 = vadd.f32 %v191_v52, %v171_v50  ;;  %v224_v61 = vadd.f32 %v220_v1, %v216_v42  ;;  %v228_v62 = vsub.f32 %v210_v46, %v200_v49 }
 0x176   :  { %v226_v63 = vadd.f32 %v222_v10, %v218_v58  ;;  %v229_v0 = vsub.f32 %v213_v47, %v198_v44  ;;  %v230_v2 = vsub.f32 %v208_v56, %v202_v54  ;;  %v231_v4 = vsub.f32 %v215_v59, %v196_v53 }
 0x177   :  { %v227_v5 = vadd.f32 %v223_v21, %v219_v60  ;;  %v232_v6 = vmul.f32 %v224_v61, %v224_v61  ;;  %v236_v7 = vmul.f32 %v228_v62, %v228_v62 }
 0x178   :  { %v234_v8 = vmul.f32 %v226_v63, %v226_v63  ;;  %v237_v11 = vmul.f32 %v229_v0, %v229_v0  ;;  %v238_v12 = vmul.f32 %v230_v2, %v230_v2  ;;  %v239_v33 = vmul.f32 %v231_v4, %v231_v4 }
 0x179   :  { %v235_v3 = vmul.f32 %v227_v5, %v227_v5  ;;  %v240_v13 = vadd.f32 %v236_v7, %v232_v6 }
 0x17a   :  { %v241_v14 = vadd.f32 %v237_v11, %v233_v55  ;;  %v242_v9 = vadd.f32 %v238_v12, %v234_v8 }
 0x17b   :  { %v245_v15 = vsel %vm244_vm9, %v240_v13, 0.0  ;;  %v243_v16 = vadd.f32 %v239_v33, %v235_v3 }
 0x17c   :  { %v246_v1 = vsel %vm244_vm9, %v241_v14, 0.0  ;;  %v248_v10 = vsel %vm244_vm9, %v242_v9, 0.0 }
 0x17d   :  { %v247_v17 = vadd.f32 %v246_v1, %v245_v15  ;;  %v250_v19 = vsel %vm244_vm9, %v243_v16, 0.0 }
 0x17f   :  { %v249_v18 = vadd.f32 %v248_v10, %v247_v17 }
 0x181   :  { %v251_v20 = vadd.f32 %v250_v19, %v249_v18 }
 0x183   :  { %252 = vadd.xlane.f32.xlu1 %v251_v20 }
 0x1f6   :  { %v253_v21 = vpop.xlane.xlu1 %252 }
 0x1f7   :  { %v254_v22 = vrot.slane %v253_v21, 4 }
 0x1f9   :  { %v255_v23 = vadd.f32 %v254_v22, %v253_v21 }
 0x1fb   :  { %v256_v24 = vrot.slane %v255_v23, 2 }
 0x1fd   :  { %v257_v25 = vadd.f32 %v256_v24, %v255_v23 }
 0x1ff   :  { %v258_v26 = vrot.slane %v257_v25, 1 }
 0x201   :  { %v259_v27 = vadd.f32 %v258_v26, %v257_v25 }
 0x203   :  { %279 = vpush %v259_v27 }
 0x234   :  { %s280_s3 = spop %279 }
 0x235   :  { %v261_v28 = vstv %s280_s3 }
 0x236   :  { %262 = vst [vmem:[#allocation2] sm:$0xff] %v261_v28 }
 0x237   :  { %273 = dma.vmem_to_hbm [thread:$0]  %s269_s27, 128, %s271_s30, [#allocation3]  }
 0x238   :  { %309 = dma.done.wait [#allocation3], 128  }
 0x239   :  { %310 = vsyncadd [#allocation3], 4294967168 }
 0x23a   :  { %278 = vsyncpa [#allocation3], 1 }

</bundles_post_ra>
